<compile_context>
chip_gen: v7x
topology: tpu7x:2x2x1
jax: 0.10.0
libtpu: 0.0.40
codegen_flags: <defaults>
</compile_context>

<pallas_src>
import functools
from typing import NamedTuple

import jax
import jax.numpy as jnp
from jax.experimental import pallas as pl
from jax.experimental.pallas import tpu as pltpu


def _cdiv(a, b):
    return -(-a // b)


def _round_up(x, m):
    return _cdiv(x, m) * m


# ---------------------------------------------------------------------------
# Hardware query (config only; the kernel build itself has no fallbacks).
# ---------------------------------------------------------------------------
def _vmem_capacity_bytes():
    default = 128 * 1024 * 1024           # v5e / v6e physical VMEM
    try:
        info = pltpu.get_tpu_info()
        cap = int(getattr(info, "vmem_capacity_bytes", default))
        return cap if cap > 0 else default
    except Exception:  # hardware probe only — never affects kernel correctness
        return default


# ---------------------------------------------------------------------------
# Kernel bodies
# ---------------------------------------------------------------------------
def _decoder_kernel(x_ref, wt_ref, b_ref, o_ref):
    """Full-IN block per grid step: out = x @ w_t + b (bf16 MXU, f32 accum)."""
    acc = jnp.dot(x_ref[...].astype(jnp.bfloat16), wt_ref[...],
                  preferred_element_type=jnp.float32)
    o_ref[...] = (acc + b_ref[...]).astype(o_ref.dtype)


def _decoder_kernel_ksplit(x_ref, wt_ref, b_ref, o_ref, acc_ref):
    """IN split over a reduction grid axis; f32 VMEM accumulator."""
    k = pl.program_id(2)

    @pl.when(k == 0)
    def _():
        acc_ref[...] = jnp.zeros_like(acc_ref)

    acc_ref[...] += jnp.dot(x_ref[...].astype(jnp.bfloat16), wt_ref[...],
                            preferred_element_type=jnp.float32)

    @pl.when(k == pl.num_programs(2) - 1)
    def _():
        o_ref[...] = (acc_ref[...] + b_ref[...]).astype(o_ref.dtype)


# ---------------------------------------------------------------------------
# One-time parameter setup (host glue, run once per model)
# ---------------------------------------------------------------------------
class DecoderMeta(NamedTuple):
    in_features: int
    out_features: int
    in_p: int
    out_p: int
    tile_k: int
    tile_n: int
    nk: int
    nn: int
    vmem_budget: int
    vmem_phys: int


def prepare_decoder_params(w_masked, bias, *, vmem_budget_bytes=None):
    """w_masked: (OUT, IN) dense weight already masked by the shallow
    connectivity pattern (equivalent to SparseLinear's coalesced values).
    bias: (OUT,).  Returns (w_t_bf16, bias_f32, meta): the weight is stored
    transposed, bf16 and padded so no per-call weight work is needed."""
    OUT, IN = w_masked.shape
    phys = _vmem_capacity_bytes()
    budget = (vmem_budget_bytes if vmem_budget_bytes is not None
              else max(16 * 1024 * 1024, int(phys * 0.55)))

    in_p0 = _round_up(IN, 128)
    out_p0 = _round_up(OUT, 128)

    # Weight tile (tile_k x tile_n) under ~1/3 of the VMEM budget
    # (double-buffered bf16).  Shrink K first (a reduction grid axis is
    # cheaper than weight re-streaming from more batch tiles), then N.
    w_budget = max(budget // 3, 2 * 128 * 128 * 2)
    tgt_k = in_p0
    tgt_n = min(out_p0, 512)            # 512 is a multiple of 256 (v6e/v7x MXU)

    def _w_tile_bytes(tk, tn):
        return 2 * tk * tn * 2

    while _w_tile_bytes(tgt_k, tgt_n) > w_budget and tgt_k > 512:
        tgt_k = max(512, _round_up(tgt_k // 2, 128))
    while _w_tile_bytes(tgt_k, tgt_n) > w_budget and tgt_n > 128:
        tgt_n = max(128, _round_up(tgt_n // 2, 128))
    while _w_tile_bytes(tgt_k, tgt_n) > w_budget and tgt_k > 128:
        tgt_k = max(128, _round_up(tgt_k // 2, 128))

    nk = _cdiv(in_p0, tgt_k)
    tile_k = _round_up(_cdiv(in_p0, nk), 128)
    in_p = nk * tile_k
    nn = _cdiv(out_p0, tgt_n)
    tile_n = _round_up(_cdiv(out_p0, nn), 128)
    out_p = nn * tile_n

    w_t = jnp.pad(jnp.transpose(jnp.asarray(w_masked)).astype(jnp.bfloat16),
                  ((0, in_p - IN), (0, out_p - OUT)))            # (IN_p, OUT_p)
    b = jnp.pad(jnp.asarray(bias, dtype=jnp.float32).reshape(1, OUT),
                ((0, 0), (0, out_p - OUT)))                      # (1, OUT_p)

    meta = DecoderMeta(IN, OUT, in_p, out_p, tile_k, tile_n, nk, nn,
                       int(budget), int(phys))
    return w_t, b, meta


# ---------------------------------------------------------------------------
# Forward
# ---------------------------------------------------------------------------
@functools.partial(jax.jit, static_argnums=(3, 4))
def _decoder_forward_impl(features, w_t, b, meta, out_dtype):
    lead_shape = features.shape[:-1]
    IN = features.shape[-1]
    assert IN == meta.in_features, "feature / weight in_features mismatch"
    x2 = features.reshape(-1, IN)
    B = x2.shape[0]

    x_bytes = jnp.dtype(features.dtype).itemsize
    out_b = jnp.dtype(out_dtype).itemsize
    sub_b = 8 if (x_bytes >= 4 and out_b >= 4) else 16

    # Batch tile: everything not already reserved for weight / bias tiles.
    fixed = (2 * meta.tile_k * meta.tile_n * 2        # bf16 weight tiles (x2 bufs)
             + 2 * 8 * meta.tile_n * 4)               # f32 bias tiles (sublane-pad)
    per_row = (2 * meta.tile_k * x_bytes              # activation tiles
               + 2 * meta.tile_n * out_b              # output tiles
               + (meta.tile_n * 4 if meta.nk > 1 else 0))  # f32 accumulator
    avail = max(meta.vmem_budget - fixed, per_row * sub_b)
    cap_b = min(1024, _round_up(B, sub_b))            # >= MXU roofline threshold
    fit_b = max(sub_b, (avail // per_row) // sub_b * sub_b)
    tile_b = min(cap_b, fit_b)
    nb = _cdiv(B, tile_b)
    tile_b = _round_up(_cdiv(B, nb), sub_b)
    # v7x has 2 TensorCores: don't collapse big problems into one grid step.
    if nb == 1 and meta.nn == 1 and meta.nk == 1 and B >= 512:
        nb = 2
        tile_b = _round_up(_cdiv(B, nb), sub_b)
    B_p = nb * tile_b

    # Grid-axis order: the operand whose block index is constant w.r.t. the
    # outer axis is fetched once; the other is re-streamed.  Pick the cheaper.
    w_total = meta.in_p * meta.out_p * 2
    x_total = B_p * meta.in_p * x_bytes
    if meta.nk == 1:
        bytes_batch_outer = x_total + nb * w_total
        bytes_out_outer = meta.nn * x_total + w_total
    else:
        bytes_batch_outer = meta.nn * x_total + nb * w_total
        bytes_out_outer = bytes_batch_outer
    batch_outer = bytes_batch_outer <= bytes_out_outer

    x = x2
    if B_p != B or meta.in_p != IN:
        x = jnp.pad(x2, ((0, B_p - B), (0, meta.in_p - IN)))

    tile_n, tile_k = meta.tile_n, meta.tile_k
    if meta.nk == 1:
        kernel = _decoder_kernel
        scratch = []
        if batch_outer:
            grid = (nb, meta.nn)
            x_spec = pl.BlockSpec((tile_b, meta.in_p), lambda i, j: (i, 0))
            w_spec = pl.BlockSpec((meta.in_p, tile_n), lambda i, j: (0, j))
            b_spec = pl.BlockSpec((1, tile_n), lambda i, j: (0, j))
            o_spec = pl.BlockSpec((tile_b, tile_n), lambda i, j: (i, j))
        else:
            grid = (meta.nn, nb)
            x_spec = pl.BlockSpec((tile_b, meta.in_p), lambda j, i: (i, 0))
            w_spec = pl.BlockSpec((meta.in_p, tile_n), lambda j, i: (0, j))
            b_spec = pl.BlockSpec((1, tile_n), lambda j, i: (0, j))
            o_spec = pl.BlockSpec((tile_b, tile_n), lambda j, i: (i, j))
        dims = ("parallel", "parallel")
    else:
        kernel = _decoder_kernel_ksplit
        scratch = [pltpu.VMEM((tile_b, tile_n), jnp.float32)]
        grid = (nb, meta.nn, meta.nk)
        x_spec = pl.BlockSpec((tile_b, tile_k), lambda i, j, k: (i, k))
        w_spec = pl.BlockSpec((tile_k, tile_n), lambda i, j, k: (k, j))
        b_spec = pl.BlockSpec((1, tile_n), lambda i, j, k: (0, j))
        o_spec = pl.BlockSpec((tile_b, tile_n), lambda i, j, k: (i, j))
        dims = ("parallel", "parallel", "arbitrary")

    est = fixed + per_row * tile_b
    vmem_limit = min(int(meta.vmem_phys * 0.75),
                     max(32 * 1024 * 1024, int(est * 1.7) + (4 << 20)))

    if meta.nk == 1:
        x_stream, w_stream = (1, nb) if batch_outer else (meta.nn, 1)
    else:
        x_stream, w_stream = meta.nn, nb
    cost = pl.CostEstimate(
        flops=2 * B_p * meta.in_p * meta.out_p,
        transcendentals=0,
        bytes_accessed=int(x_stream * x_total + w_stream * w_total
                           + meta.out_p * 4 + B_p * meta.out_p * out_b),
    )

    out_padded = pl.pallas_call(
        kernel,
        out_shape=jax.ShapeDtypeStruct((B_p, meta.out_p), out_dtype),
        grid_spec=pltpu.PrefetchScalarGridSpec(
            num_scalar_prefetch=0,
            grid=grid,
            in_specs=[x_spec, w_spec, b_spec],
            out_specs=o_spec,
            scratch_shapes=scratch,
        ),
        compiler_params=pltpu.CompilerParams(
            dimension_semantics=dims,
            vmem_limit_bytes=vmem_limit,
        ),
        cost_estimate=cost,
    )(x, w_t, b)

    out = out_padded[:B, :meta.out_features]
    return out.reshape(*lead_shape, meta.out_features)


def ae_decoder_forward(features, params, *, out_dtype=None):
    """AEDecoder.forward: features @ W_masked^T + bias."""
    w_t, b, meta = params
    dt = jnp.dtype(features.dtype if out_dtype is None else out_dtype)
    return _decoder_forward_impl(features, w_t, b, meta, dt)


# ---------------------------------------------------------------------------
# Synthetic shallow connectivity (host glue)
# ---------------------------------------------------------------------------
def make_shallow_connectivity_mask(in_features, out_features):
    """Deterministic synthetic 'shallow' connectivity mask (out, in).

    Mimics Shallow(data_obj).shallow_layer: each input feature is wired to a
    small set of outputs (here: input i -> outputs {i % OUT, (i // 3) % OUT}).
    """
    # TODO(synk): real Shallow(data_obj) connectivity comes from the dataset;
    # a deterministic synthetic pattern is used here.
    i_idx = jnp.arange(in_features)
    out0 = i_idx % out_features
    out1 = (i_idx // 3) % out_features
    mask = jnp.zeros((out_features, in_features), dtype=jnp.float32)
    mask = mask.at[out0, i_idx].set(1.0)
    mask = mask.at[out1, i_idx].set(1.0)
    return mask


if __name__ == "__main__":
    key = jax.random.PRNGKey(0)

    def run_case(case_key, B, IN, OUT, vmem_budget_bytes=None):
        kx, kw, kb = jax.random.split(case_key, 3)
        features = jax.random.normal(kx, (B, IN), dtype=jnp.float32)
        mask = make_shallow_connectivity_mask(IN, OUT)               # (OUT, IN)
        w_masked = jax.random.normal(kw, (OUT, IN), dtype=jnp.float32) * 0.1 * mask
        bias = jax.random.normal(kb, (OUT,), dtype=jnp.float32) * 0.01

        params = prepare_decoder_params(w_masked, bias,
                                        vmem_budget_bytes=vmem_budget_bytes)
        out = jax.block_until_ready(ae_decoder_forward(features, params))
        assert out.shape == (B, OUT)

        # Kernel uses bf16 operands with f32 accumulation: tight check against a
        # bf16-matched reference, loose check against the pure-f32 reference.
        ref_bf16 = (jnp.dot(features.astype(jnp.bfloat16),
                            w_masked.T.astype(jnp.bfloat16),
                            preferred_element_type=jnp.float32) + bias[None, :])
        ref_f32 = features @ w_masked.T + bias[None, :]
        assert jnp.allclose(out, ref_bf16, atol=5e-3, rtol=5e-3), (B, IN, OUT)
        assert jnp.allclose(out, ref_f32, atol=5e-2, rtol=5e-2), (B, IN, OUT)

    k1, k2, k3 = jax.random.split(key, 3)
    # 1) module-implied small shape
    run_case(k1, B=8, IN=64, OUT=32)
    # 2) unaligned shapes (exercises batch / IN / OUT padding and slicing)
    run_case(k2, B=12, IN=200, OUT=136)
    # 3) tiny VMEM budget: exercises the K-reduction ("arbitrary") axis with the
    #    f32 accumulator and a multi-tile OUT axis.
    run_case(k3, B=64, IN=1024, OUT=512, vmem_budget_bytes=3 * 1024 * 1024 // 2)

    print("KERNEL_OK")
</pallas_src>

<mosaic_0001>
module attributes {stable_mosaic.version = 11 : i64} {
  func.func @_decoder_kernel(%arg0: i32, %arg1: i32, %arg2: memref<8x128xf32, #tpu.memory_space<vmem>>, %arg3: memref<128x128xbf16, #tpu.memory_space<vmem>>, %arg4: memref<1x128xf32, #tpu.memory_space<vmem>>, %arg5: memref<8x128xf32, #tpu.memory_space<vmem>>) attributes {dimension_semantics = [#tpu.dimension_semantics<parallel>, #tpu.dimension_semantics<parallel>], iteration_bounds = array<i64: 1, 1>, scalar_prefetch = 0 : i64, scratch_operands = 0 : i64, tpu.core_type = #tpu.core_type<tc>, window_params = [{transform_indices = @transform_0, window_bounds = array<i64: 8, 128>}, {transform_indices = @transform_1, window_bounds = array<i64: 128, 128>}, {transform_indices = @transform_2, window_bounds = array<i64: 1, 128>}, {transform_indices = @transform_3, window_bounds = array<i64: 8, 128>}]} {
    %c0 = arith.constant 0 : index
    %c0_0 = arith.constant 0 : index
    %0 = vector.load %arg2[%c0, %c0_0] : memref<8x128xf32, #tpu.memory_space<vmem>>, vector<8x128xf32>
    %1 = arith.truncf %0 : vector<8x128xf32> to vector<8x128xbf16>
    %c0_1 = arith.constant 0 : index
    %c0_2 = arith.constant 0 : index
    %2 = vector.load %arg3[%c0_1, %c0_2] : memref<128x128xbf16, #tpu.memory_space<vmem>>, vector<128x128xbf16>
    %cst = arith.constant dense<0.000000e+00> : vector<8x128xf32>
    %3 = tpu.matmul %1, %2, %cst {dimension_numbers = #tpu.dot_dimension_numbers<[1], [0], [0], [1], [0, 0, 1, 1], [], []>} : vector<8x128xbf16>, vector<128x128xbf16>, vector<8x128xf32> -> vector<8x128xf32>
    %c0_3 = arith.constant 0 : index
    %c0_4 = arith.constant 0 : index
    %4 = vector.load %arg4[%c0_3, %c0_4] : memref<1x128xf32, #tpu.memory_space<vmem>>, vector<1x128xf32>
    %5 = vector.broadcast %4 : vector<1x128xf32> to vector<8x128xf32>
    %6 = arith.addf %3, %5 : vector<8x128xf32>
    %c0_5 = arith.constant 0 : index
    %c0_6 = arith.constant 0 : index
    %7 = vector.load %arg5[%c0_5, %c0_6] : memref<8x128xf32, #tpu.memory_space<vmem>>, vector<8x128xf32>
    tpu.vector_store %arg5[%c0_5, %c0_6], %6 {strides = array<i32>} : memref<8x128xf32, #tpu.memory_space<vmem>>, vector<8x128xf32>,
    return
  }
  func.func @transform_0(%arg0: i32, %arg1: i32) -> (i32, i32) {
    %c0_i32 = arith.constant 0 : i32
    %c0_i32_0 = arith.constant 0 : i32
    return %arg0, %c0_i32 : i32, i32
  }
  func.func @transform_1(%arg0: i32, %arg1: i32) -> (i32, i32) {
    %c0_i32 = arith.constant 0 : i32
    %c0_i32_0 = arith.constant 0 : i32
    return %c0_i32, %arg1 : i32, i32
  }
  func.func @transform_2(%arg0: i32, %arg1: i32) -> (i32, i32) {
    %c0_i32 = arith.constant 0 : i32
    %c0_i32_0 = arith.constant 0 : i32
    return %c0_i32, %arg1 : i32, i32
  }
  func.func @transform_3(%arg0: i32, %arg1: i32) -> (i32, i32) {
    %c0_i32 = arith.constant 0 : i32
    return %arg0, %arg1 : i32, i32
  }
}

</mosaic_0001>

<bundles_post_ra>
// kernel: _decoder_forward_impl.1
= control target key start
LH: loop header
LB: loop body
LE: loop exit
PB: predicated region body
PF: predicated region fallthrough
CT: control target
= control target key end

     0   :  { %8 = vsyncpa [#allocation3], 0  ;;  %s315_s0 = inlined_call_operand.vmem [shape: f32[8,128], index: 0, kind: input, shape index: {}]   ;;  %s316_s1 = inlined_call_operand.hbm [shape: bf16[128,128], index: 1, kind: input, shape index: {}]   ;;  %s317_s2 = inlined_call_operand.vmem [shape: f32[1,128], index: 2, kind: input, shape index: {}]   ;;  %s318_s3 = inlined_call_operand.hbm [shape: f32[8,128], index: 3, kind: output, shape index: {}]  }
   0x1   :  { %9 = vsyncpa [#allocation4], 0  ;;  %s259_s12 = smov [#allocation2]   ;;  %s211_s16 = scalar_lea.hbm %s316_s1, 1024 }
   0x2   :  { %s17_s13 = sshll.u32 %s259_s12, 4  ;;  %p212_p0 = scmp.ne.s32.totalorder %s316_s1, %s211_s16  ;;  %s18_s13 = int_to_ptr.vmem [resolvable:$true] %s17_s13 }
   0x3   :  { %p215_p1 = scmp.lt.u32.totalorder %s211_s16, %s316_s1 }
   0x5   :  { %p217_p2 = pnand %p215_p1, %p212_p0 }
   0x7   :  { %220 = shalt.err (!%p217_p2)
}
   0x8   :  { %s221_s21 = scalar_lea.vmem %s18_s13, 1024  ;;  %p226_p4 = scmp.lt.s32.totalorder %s18_s13, %s18_s13 }
   0x9   :  { %p222_p3 = scmp.ne.s32.totalorder %s18_s13, %s221_s21  ;;  %p227_p5 = scmp.lt.s32.totalorder %s221_s21, %s221_s21 }
   0xb   :  { %p228_p6 = por %p227_p5, %p226_p4 }
   0xd   :  { %p229_p7 = pnand %p228_p6, %p222_p3 }
   0xf   :  { %232 = shalt.err (!%p229_p7)
}
  0x10   :  { %s260_s22 = smov 64   ;;  %s261_s23 = smov 4  }
  0x11   :  { %23 = dma.hbm_to_vmem [thread:$0]  %s316_s1, 1024, %s18_s13, [#allocation3], %s260_s22, %s260_s22, %s261_s23  }
  0x12   :  { %255 = dma.done.wait [#allocation3], 1024  }
  0x13   :  { %256 = vsyncadd [#allocation3], 4294966272  ;;  %v262_v0 = vmov 0.0   ;;  %vm263_vm0 = vmmov 0   ;;  %v203_v1 = vld [vmem:[#allocation2] sm:$0xff]   ;;  %v204_v2 = vld [vmem:[#allocation2 + $0x8] sm:$0xff]  }
  0x14   :  { %177 = vmatprep.subr.bf16.mxu0 %v262_v0  ;;  %193 = vmatprep.mubr.msk.bf16.mxu0 %vm263_vm0, %v262_v0  ;;  %v205_v3 = vld [vmem:[#allocation2 + $0x10] sm:$0xff]   ;;  %v206_v4 = vld [vmem:[#allocation2 + $0x18] sm:$0xff]   ;;  %v207_v5 = vld [vmem:[#allocation2 + $0x20] sm:$0xff]   ;;  %s264_s29 = smov [#allocation5]  }
  0x15   :  { %178 = vmatpush3.bf16.msra.mxu0 %v203_v1  ;;  %v208_v6 = vld [vmem:[#allocation2 + $0x28] sm:$0xff]   ;;  %v209_v7 = vld [vmem:[#allocation2 + $0x30] sm:$0xff]   ;;  %v210_v8 = vld [vmem:[#allocation2 + $0x38] sm:$0xff]   ;;  %s150_s30 = sshll.u32 %s264_s29, 4  ;;  %s151_s30 = int_to_ptr.vmem [resolvable:$true] %s150_s30 }
  0x16   :  { %179 = vmatprep.subr.bf16.mxu0 %v262_v0  ;;  %v30_v9 = vld [vmem:[%s315_s0] sm:$0xff]  ;;  %s233_s4 = scalar_lea.vmem %s151_s30, 128  ;;  %p238_p9 = scmp.lt.s32.totalorder %s151_s30, %s151_s30 }
  0x17   :  { %v31_v10 = vpack.c.bf16 %v30_v9, %v30_v9  ;;  %v159_v11 = vld [vmem:[%s317_s2] ss:$0 sm:$0xff]  ;;  %p234_p8 = scmp.ne.s32.totalorder %s151_s30, %s233_s4  ;;  %p239_p10 = scmp.lt.s32.totalorder %s233_s4, %s233_s4 }
  0x19   :  { %180 = vmatpush3.bf16.msra.mxu0 %v204_v2  ;;  %p240_p11 = por %p239_p10, %p238_p9 }
  0x1a   :  { %181 = vmatprep.subr.bf16.mxu0 %v262_v0 }
  0x1b   :  { %p241_p12 = pnand %p240_p11, %p234_p8 }
  0x1d   :  { %182 = vmatpush3.bf16.msra.mxu0 %v205_v3 }
  0x1e   :  { %183 = vmatprep.subr.bf16.mxu0 %v262_v0 }
  0x21   :  { %184 = vmatpush3.bf16.msra.mxu0 %v206_v4 }
  0x22   :  { %185 = vmatprep.subr.bf16.mxu0 %v262_v0 }
  0x25   :  { %186 = vmatpush3.bf16.msra.mxu0 %v207_v5 }
  0x26   :  { %187 = vmatprep.subr.bf16.mxu0 %v262_v0 }
  0x29   :  { %188 = vmatpush3.bf16.msra.mxu0 %v208_v6 }
  0x2a   :  { %189 = vmatprep.subr.bf16.mxu0 %v262_v0 }
  0x2d   :  { %190 = vmatpush3.bf16.msra.mxu0 %v209_v7 }
  0x2e   :  { %191 = vmatprep.subr.bf16.mxu0 %v262_v0 }
  0x31   :  { %192 = vmatpush3.bf16.msra.mxu0 %v210_v8 }
  0x34   :  { %194 = vmatmul.mubr.bf16.vlgmr.msra.gmra.mrb[0].mxu0 %v31_v10 }
 0x107   :  { %v137_v12 = vpop.f32.mrb[0].mxu0 }
 0x108   :  { %v138_v13 = vadd.f32 %v159_v11, %v137_v12  ;;  %v195_v14 = vpop.f32.mrb[1].mxu0 }
 0x109   :  { %v140_v15 = vpop.f32.mrb[2].mxu0 }
 0x10a   :  { %143 = vst [vmem:[#allocation5] sm:$0xff] %v138_v13  ;;  %v196_v16 = vpop.f32.mrb[3].mxu0 }
 0x10b   :  { %244 = shalt.err (!%p241_p12)
}
 0x10c   :  { %s245_s2 = scalar_lea.hbm %s318_s3, 128 }
 0x10d   :  { %p246_p13 = scmp.ne.s32.totalorder %s318_s3, %s245_s2  ;;  %p249_p0 = scmp.lt.u32.totalorder %s245_s2, %s318_s3 }
 0x10f   :  { %p251_p1 = pnand %p249_p0, %p246_p13 }
 0x111   :  { %254 = shalt.err (!%p251_p1)
}
 0x112   :  { %153 = dma.vmem_to_hbm [thread:$0]  %s151_s30, 128, %s318_s3, [#allocation4]  }
 0x113   :  { %257 = dma.done.wait [#allocation4], 128  }
 0x114   :  { %258 = vsyncadd [#allocation4], 4294967168 }
 0x115   :  { %157 = vsyncpa [#allocation3], 1 }
 0x116   :  { %158 = vsyncpa [#allocation4], 1 }

</bundles_post_ra>
